<compile_context>
chip_gen: v7x
topology: tpu7x:2x2x1
jax: 0.10.0
libtpu: 0.0.40
codegen_flags: <defaults>
</compile_context>

<pallas_src>
import functools
import math

import jax
import jax.numpy as jnp
from jax.experimental import pallas as pl
from jax.experimental.pallas import tpu as pltpu

EPS = 1e-5                      # nn.LayerNorm default eps
_GELU_C = math.sqrt(2.0 / math.pi)


# ----------------------------- in-kernel math helpers -----------------------------

def _ln(x, g, b):
    """LayerNorm over last dim (biased variance, eps=1e-5), like nn.LayerNorm."""
    mu = jnp.mean(x, axis=-1, keepdims=True)
    var = jnp.mean((x - mu) ** 2, axis=-1, keepdims=True)
    return (x - mu) * jax.lax.rsqrt(var + EPS) * g + b


def _gelu_tanh(x):
    # tanh-approximate GELU (EUP tanh).  PyTorch nn.GELU() default is exact erf;
    # deviation is <~3e-3 abs — covered by the test tolerance against the erf reference.
    return 0.5 * x * (1.0 + jnp.tanh(_GELU_C * (x + 0.044715 * (x * x * x))))


# ----------------------------- fused AttentionBlock kernel -----------------------------

def attention_block_kernel(x_ref,
                           ln1_g_ref, ln1_b_ref,
                           wqkv_ref, bqkv_ref, wo_ref, bo_ref,
                           ln2_g_ref, ln2_b_ref,
                           w1_ref, b1_ref, w2_ref, b2_ref,
                           o_ref, *, num_heads, mxu_dtype):
    bpb, seq, embed = x_ref.shape           # block = (batches_per_block, L, E)
    n = bpb * seq
    dh = embed // num_heads

    # Merge (batch, seq) into the sublane/row dim — free (leading-dim merge).
    x = x_ref[...].reshape(n, embed)                          # fp32 residual stream

    # ---------------- multi-head self-attention ----------------
    xln = _ln(x, ln1_g_ref[...], ln1_b_ref[...])              # (n, E)
    qkv = jnp.dot(xln.astype(mxu_dtype), wqkv_ref[...],
                  preferred_element_type=jnp.float32) + bqkv_ref[...]   # (n, 3E), one MXU push
    qkv_m = qkv.astype(mxu_dtype)                             # single cast for attention matmuls

    head_outs = []
    # Static unroll is fine at H<=4; fold heads into a fori_loop / batched einsum if H grows.
    for h in range(num_heads):
        lo = h * dh
        qh = qkv_m[:, lo:lo + dh].reshape(bpb, seq, dh)                       # q pre-scaled
        kh = qkv_m[:, embed + lo:embed + lo + dh].reshape(bpb, seq, dh)
        vh = qkv_m[:, 2 * embed + lo:2 * embed + lo + dh].reshape(bpb, seq, dh)

        s = jnp.einsum('bld,bmd->blm', qh, kh, preferred_element_type=jnp.float32)
        s = s - jnp.max(s, axis=-1, keepdims=True)
        e = jnp.exp(s)
        p = e * pl.reciprocal(jnp.sum(e, axis=-1, keepdims=True), approx=True)
        oh = jnp.einsum('blm,bmd->bld', p.astype(mxu_dtype), vh,
                        preferred_element_type=jnp.float32)
        head_outs.append(oh.reshape(n, dh))

    # Lane-concat of head outputs == PyTorch head concat; then ONE (n,E)@(E,E) out-proj.
    o_heads = jnp.concatenate(head_outs, axis=-1)             # (n, E)
    attn = jnp.dot(o_heads.astype(mxu_dtype), wo_ref[...],
                   preferred_element_type=jnp.float32) + bo_ref[...]
    x = x + attn

    # ---------------- feed-forward: Linear -> GELU -> Dropout(id) -> Linear -> Dropout(id) ----------------
    y = _ln(x, ln2_g_ref[...], ln2_b_ref[...])
    hmid = jnp.dot(y.astype(mxu_dtype), w1_ref[...],
                   preferred_element_type=jnp.float32) + b1_ref[...]
    hmid = _gelu_tanh(hmid)
    out = jnp.dot(hmid.astype(mxu_dtype), w2_ref[...],
                  preferred_element_type=jnp.float32) + b2_ref[...]

    o_ref[...] = (x + out).reshape(bpb, seq, embed)


# ----------------------------- wrapper (pallas_call) -----------------------------

PARAM_ORDER = ('ln1_g', 'ln1_b', 'wqkv', 'bqkv', 'wo', 'bo',
               'ln2_g', 'ln2_b', 'w1', 'b1', 'w2', 'b2')


def attention_block_pallas(x_sbe, kparams, *, num_heads, batches_per_block=1):
    """x_sbe: (L, B, E) seq-first, as in the PyTorch module.  Returns (L, B, E)."""
    L, B, E = x_sbe.shape
    assert B % batches_per_block == 0
    bpb = batches_per_block

    # TODO(synk): at scale, accept batch-major input to avoid these wrapper transposes.
    x_ble = jnp.transpose(x_sbe, (1, 0, 2)).astype(jnp.float32)        # (B, L, E)

    grid = (B // bpb,)
    in_specs = [pl.BlockSpec((bpb, L, E), lambda i: (i, 0, 0))]
    # Packed weights: full-array blocks, constant index_map -> loaded once, VMEM-resident.
    in_specs += [pl.BlockSpec(kparams[name].shape, lambda i: (0, 0))
                 for name in PARAM_ORDER]
    out_specs = pl.BlockSpec((bpb, L, E), lambda i: (i, 0, 0))

    out_ble = pl.pallas_call(
        functools.partial(attention_block_kernel, num_heads=num_heads,
                          mxu_dtype=kparams['wqkv'].dtype),
        out_shape=jax.ShapeDtypeStruct((B, L, E), jnp.float32),
        grid=grid,
        in_specs=in_specs,
        out_specs=out_specs,
        compiler_params=pltpu.CompilerParams(
            # Batch groups are fully independent -> parallel axis (v7x 2nd TensorCore).
            dimension_semantics=("parallel",),
            # NOTE: at ViT-scale E/hidden, also set vmem_limit_bytes and shrink bpb.
        ),
    )(x_ble, *[kparams[name] for name in PARAM_ORDER])

    return jnp.transpose(out_ble, (1, 0, 2))


# ----------------------------- parameter prep (wrapper-side layout plumbing) -----------------------------

def _mxu_dtype():
    """bf16 MXU operands on every TPU generation (v5e MXU is bf16-native);
    fp32 fallback off-TPU (e.g. interpret/CPU)."""
    try:
        plat = jax.devices()[0].platform
    except Exception:
        return jnp.float32
    return jnp.bfloat16 if plat == 'tpu' else jnp.float32


def prepare_params(p, *, num_heads, mxu_dtype):
    """PyTorch-layout params -> kernel layout: x@W orientation, packed lane-dense
    weights, 1/sqrt(dh) folded into the q columns of the packed QKV projection."""
    E = p['ln1_g'].shape[0]
    dh = E // num_heads
    scale = 1.0 / math.sqrt(dh)

    # fold attention scale into the q third of the packed projection
    col_scale = jnp.concatenate([jnp.full((E,), scale, jnp.float32),
                                 jnp.ones((2 * E,), jnp.float32)])
    wqkv = (p['in_proj_weight'].T * col_scale).astype(mxu_dtype)       # (E, 3E)
    bqkv = (p['in_proj_bias'] * col_scale).reshape(1, 3 * E).astype(jnp.float32)

    return {
        'ln1_g': p['ln1_g'].reshape(1, E), 'ln1_b': p['ln1_b'].reshape(1, E),
        'wqkv': wqkv, 'bqkv': bqkv,
        'wo': p['out_proj_weight'].T.astype(mxu_dtype),                # (E, E)
        'bo': p['out_proj_bias'].reshape(1, E),
        'ln2_g': p['ln2_g'].reshape(1, E), 'ln2_b': p['ln2_b'].reshape(1, E),
        'w1': p['lin1_w'].T.astype(mxu_dtype), 'b1': p['lin1_b'].reshape(1, -1),
        'w2': p['lin2_w'].T.astype(mxu_dtype), 'b2': p['lin2_b'].reshape(1, E),
    }


def init_params(key, *, embed_dim, hidden_dim):
    """Deterministic params in PyTorch conventions (Linear weight = (out, in))."""
    E, Hd = embed_dim, hidden_dim
    ks = jax.random.split(key, 8)

    def w(k, shape, scale=0.05):
        return scale * jax.random.normal(k, shape, dtype=jnp.float32)

    return {
        'ln1_g': jnp.ones((E,), jnp.float32), 'ln1_b': jnp.zeros((E,), jnp.float32),
        'in_proj_weight': w(ks[0], (3 * E, E)),
        'in_proj_bias': w(ks[1], (3 * E,), 0.02),
        'out_proj_weight': w(ks[2], (E, E)),
        'out_proj_bias': w(ks[3], (E,), 0.02),
        'ln2_g': jnp.ones((E,), jnp.float32), 'ln2_b': jnp.zeros((E,), jnp.float32),
        'lin1_w': w(ks[4], (Hd, E)), 'lin1_b': w(ks[5], (Hd,), 0.02),
        'lin2_w': w(ks[6], (E, Hd)), 'lin2_b': w(ks[7], (E,), 0.02),
    }


# ----------------------------- pure-JAX reference (matches the PyTorch module) -----------------------------

def attention_block_ref(x_sbe, p, *, num_heads):
    L, B, E = x_sbe.shape
    H, dh = num_heads, E // num_heads
    x = x_sbe.astype(jnp.float32)

    def ln(v, g, b):
        mu = v.mean(-1, keepdims=True)
        var = ((v - mu) ** 2).mean(-1, keepdims=True)
        return (v - mu) / jnp.sqrt(var + EPS) * g + b

    inp = ln(x, p['ln1_g'], p['ln1_b'])
    qkv = inp @ p['in_proj_weight'].T + p['in_proj_bias']              # (L, B, 3E)
    q, k, v = jnp.split(qkv, 3, axis=-1)

    def heads(t):                                                      # (L,B,E)->(B,H,L,dh)
        return jnp.transpose(t.reshape(L, B, H, dh), (1, 2, 0, 3))

    qh, kh, vh = heads(q), heads(k), heads(v)
    s = jnp.einsum('bhld,bhmd->bhlm', qh, kh) / math.sqrt(dh)
    a = jax.nn.softmax(s, axis=-1)
    o = jnp.einsum('bhlm,bhmd->bhld', a, vh)
    o = jnp.transpose(o, (2, 0, 1, 3)).reshape(L, B, E)
    x = x + (o @ p['out_proj_weight'].T + p['out_proj_bias'])

    y = ln(x, p['ln2_g'], p['ln2_b'])
    h1 = y @ p['lin1_w'].T + p['lin1_b']
    h1 = jax.nn.gelu(h1, approximate=False)        # exact erf GELU = PyTorch nn.GELU default
    h2 = h1 @ p['lin2_w'].T + p['lin2_b']
    return x + h2


# ----------------------------- main -----------------------------

if __name__ == "__main__":
    # Small shapes consistent with the module: seq-first input (L, B, E).
    L, B = 8, 2
    embed_dim, hidden_dim, num_heads = 32, 64, 4

    key = jax.random.PRNGKey(0)
    kx, kp = jax.random.split(key)
    x = jax.random.normal(kx, (L, B, embed_dim), dtype=jnp.float32)

    params = init_params(kp, embed_dim=embed_dim, hidden_dim=hidden_dim)
    kparams = prepare_params(params, num_heads=num_heads, mxu_dtype=_mxu_dtype())

    fwd = jax.jit(functools.partial(attention_block_pallas, num_heads=num_heads))
    out = fwd(x, kparams)
    jax.block_until_ready(out)

    ref = attention_block_ref(x, params, num_heads=num_heads)

    assert out.shape == (L, B, embed_dim)
    assert bool(jnp.all(jnp.isfinite(out)))
    # Tolerance covers bf16 MXU operands, EUP approx reciprocal and tanh-GELU vs exact erf.
    err = float(jnp.max(jnp.abs(out - ref)))
    assert bool(jnp.allclose(out, ref, atol=2e-2, rtol=2e-2)), f"max abs err = {err}"
    print("KERNEL_OK")
</pallas_src>

<mosaic_0001>
module attributes {stable_mosaic.version = 11 : i64} {
  func.func @attention_block_kernel(%arg0: i32, %arg1: memref<1x8x32xf32, #tpu.memory_space<vmem>>, %arg2: memref<1x32xf32, #tpu.memory_space<vmem>>, %arg3: memref<1x32xf32, #tpu.memory_space<vmem>>, %arg4: memref<32x96xf32, #tpu.memory_space<vmem>>, %arg5: memref<1x96xf32, #tpu.memory_space<vmem>>, %arg6: memref<32x32xf32, #tpu.memory_space<vmem>>, %arg7: memref<1x32xf32, #tpu.memory_space<vmem>>, %arg8: memref<1x32xf32, #tpu.memory_space<vmem>>, %arg9: memref<1x32xf32, #tpu.memory_space<vmem>>, %arg10: memref<32x64xf32, #tpu.memory_space<vmem>>, %arg11: memref<1x64xf32, #tpu.memory_space<vmem>>, %arg12: memref<64x32xf32, #tpu.memory_space<vmem>>, %arg13: memref<1x32xf32, #tpu.memory_space<vmem>>, %arg14: memref<1x8x32xf32, #tpu.memory_space<vmem>>) attributes {dimension_semantics = [#tpu.dimension_semantics<parallel>], iteration_bounds = array<i64: 2>, scalar_prefetch = 0 : i64, scratch_operands = 0 : i64, tpu.core_type = #tpu.core_type<tc>, window_params = [{transform_indices = @transform_0, window_bounds = array<i64: 1, 8, 32>}, {pipeline_mode = #tpu.pipeline_mode<synchronous>, transform_indices = @transform_1, window_bounds = array<i64: 1, 32>}, {pipeline_mode = #tpu.pipeline_mode<synchronous>, transform_indices = @transform_2, window_bounds = array<i64: 1, 32>}, {pipeline_mode = #tpu.pipeline_mode<synchronous>, transform_indices = @transform_3, window_bounds = array<i64: 32, 96>}, {pipeline_mode = #tpu.pipeline_mode<synchronous>, transform_indices = @transform_4, window_bounds = array<i64: 1, 96>}, {pipeline_mode = #tpu.pipeline_mode<synchronous>, transform_indices = @transform_5, window_bounds = array<i64: 32, 32>}, {pipeline_mode = #tpu.pipeline_mode<synchronous>, transform_indices = @transform_6, window_bounds = array<i64: 1, 32>}, {pipeline_mode = #tpu.pipeline_mode<synchronous>, transform_indices = @transform_7, window_bounds = array<i64: 1, 32>}, {pipeline_mode = #tpu.pipeline_mode<synchronous>, transform_indices = @transform_8, window_bounds = array<i64: 1, 32>}, {pipeline_mode = #tpu.pipeline_mode<synchronous>, transform_indices = @transform_9, window_bounds = array<i64: 32, 64>}, {pipeline_mode = #tpu.pipeline_mode<synchronous>, transform_indices = @transform_10, window_bounds = array<i64: 1, 64>}, {pipeline_mode = #tpu.pipeline_mode<synchronous>, transform_indices = @transform_11, window_bounds = array<i64: 64, 32>}, {pipeline_mode = #tpu.pipeline_mode<synchronous>, transform_indices = @transform_12, window_bounds = array<i64: 1, 32>}, {transform_indices = @transform_13, window_bounds = array<i64: 1, 8, 32>}]} {
    %c0 = arith.constant 0 : index
    %c0_0 = arith.constant 0 : index
    %c0_1 = arith.constant 0 : index
    %0 = vector.load %arg1[%c0, %c0_0, %c0_1] : memref<1x8x32xf32, #tpu.memory_space<vmem>>, vector<1x8x32xf32>
    %1 = vector.shape_cast %0 : vector<1x8x32xf32> to vector<8x32xf32>
    %c0_2 = arith.constant 0 : index
    %c0_3 = arith.constant 0 : index
    %2 = vector.load %arg2[%c0_2, %c0_3] : memref<1x32xf32, #tpu.memory_space<vmem>>, vector<1x32xf32>
    %c0_4 = arith.constant 0 : index
    %c0_5 = arith.constant 0 : index
    %3 = vector.load %arg3[%c0_4, %c0_5] : memref<1x32xf32, #tpu.memory_space<vmem>>, vector<1x32xf32>
    %cst = arith.constant dense<0.000000e+00> : vector<8xf32>
    %4 = vector.multi_reduction <add>, %1, %cst [1] : vector<8x32xf32> to vector<8xf32>
    %5 = vector.shape_cast %4 : vector<8xf32> to vector<8x1xf32>
    %cst_6 = arith.constant 3.200000e+01 : f32
    %6 = vector.broadcast %cst_6 : f32 to vector<8x1xf32>
    %7 = arith.divf %5, %6 : vector<8x1xf32>
    %8 = vector.broadcast %7 : vector<8x1xf32> to vector<8x32xf32>
    %9 = arith.subf %1, %8 : vector<8x32xf32>
    %10 = arith.mulf %9, %9 : vector<8x32xf32>
    %cst_7 = arith.constant dense<0.000000e+00> : vector<8xf32>
    %11 = vector.multi_reduction <add>, %10, %cst_7 [1] : vector<8x32xf32> to vector<8xf32>
    %12 = vector.shape_cast %11 : vector<8xf32> to vector<8x1xf32>
    %cst_8 = arith.constant 3.200000e+01 : f32
    %13 = vector.broadcast %cst_8 : f32 to vector<8x1xf32>
    %14 = arith.divf %12, %13 : vector<8x1xf32>
    %15 = vector.broadcast %7 : vector<8x1xf32> to vector<8x32xf32>
    %16 = arith.subf %1, %15 : vector<8x32xf32>
    %cst_9 = arith.constant 9.99999974E-6 : f32
    %17 = vector.broadcast %cst_9 : f32 to vector<8x1xf32>
    %18 = arith.addf %14, %17 : vector<8x1xf32>
    %19 = math.rsqrt %18 : vector<8x1xf32>
    %20 = vector.broadcast %19 : vector<8x1xf32> to vector<8x32xf32>
    %21 = arith.mulf %16, %20 : vector<8x32xf32>
    %22 = vector.broadcast %2 : vector<1x32xf32> to vector<8x32xf32>
    %23 = arith.mulf %21, %22 : vector<8x32xf32>
    %24 = vector.broadcast %3 : vector<1x32xf32> to vector<8x32xf32>
    %25 = arith.addf %23, %24 : vector<8x32xf32>
    %c0_10 = arith.constant 0 : index
    %c0_11 = arith.constant 0 : index
    %26 = vector.load %arg4[%c0_10, %c0_11] : memref<32x96xf32, #tpu.memory_space<vmem>>, vector<32x96xf32>
    %cst_12 = arith.constant dense<0.000000e+00> : vector<8x96xf32>
    %27 = tpu.matmul %25, %26, %cst_12 {dimension_numbers = #tpu.dot_dimension_numbers<[1], [0], [0], [1], [0, 0, 1, 1], [], []>} : vector<8x32xf32>, vector<32x96xf32>, vector<8x96xf32> -> vector<8x96xf32>
    %c0_13 = arith.constant 0 : index
    %c0_14 = arith.constant 0 : index
    %28 = vector.load %arg5[%c0_13, %c0_14] : memref<1x96xf32, #tpu.memory_space<vmem>>, vector<1x96xf32>
    %29 = vector.broadcast %28 : vector<1x96xf32> to vector<8x96xf32>
    %30 = arith.addf %27, %29 : vector<8x96xf32>
    %31 = vector.extract_strided_slice %30 {offsets = [0, 0], sizes = [8, 8], strides = [1, 1]} : vector<8x96xf32> to vector<8x8xf32>
    %32 = vector.shape_cast %31 : vector<8x8xf32> to vector<1x8x8xf32>
    %33 = vector.extract_strided_slice %30 {offsets = [0, 32], sizes = [8, 8], strides = [1, 1]} : vector<8x96xf32> to vector<8x8xf32>
    %34 = vector.shape_cast %33 : vector<8x8xf32> to vector<1x8x8xf32>
    %35 = vector.extract_strided_slice %30 {offsets = [0, 64], sizes = [8, 8], strides = [1, 1]} : vector<8x96xf32> to vector<8x8xf32>
    %36 = vector.shape_cast %35 : vector<8x8xf32> to vector<1x8x8xf32>
    "tpu.trace_start"() <{level = 10 : i32, message = "bld,bmd->blm"}> : () -> ()
    %cst_15 = arith.constant dense<0.000000e+00> : vector<1x8x8xf32>
    %37 = tpu.matmul %32, %34, %cst_15 {dimension_numbers = #tpu.dot_dimension_numbers<[2], [2], [1], [1], [0, 0, 0, 1, 1, 1], [0], [0]>} : vector<1x8x8xf32>, vector<1x8x8xf32>, vector<1x8x8xf32> -> vector<1x8x8xf32>
    "tpu.trace_stop"() : () -> ()
    %cst_16 = arith.constant dense<0xFF800000> : vector<1x8xf32>
    %38 = vector.multi_reduction <maximumf>, %37, %cst_16 [2] : vector<1x8x8xf32> to vector<1x8xf32>
    %39 = vector.shape_cast %38 : vector<1x8xf32> to vector<1x8x1xf32>
    %40 = vector.broadcast %39 : vector<1x8x1xf32> to vector<1x8x8xf32>
    %41 = arith.subf %37, %40 : vector<1x8x8xf32>
    %42 = math.exp %41 : vector<1x8x8xf32>
    %cst_17 = arith.constant dense<0.000000e+00> : vector<1x8xf32>
    %43 = vector.multi_reduction <add>, %42, %cst_17 [2] : vector<1x8x8xf32> to vector<1x8xf32>
    %44 = vector.shape_cast %43 : vector<1x8xf32> to vector<1x8x1xf32>
    %45 = tpu.reciprocal %44 {approx = true} : vector<1x8x1xf32> -> vector<1x8x1xf32>
    %46 = vector.broadcast %45 : vector<1x8x1xf32> to vector<1x8x8xf32>
    %47 = arith.mulf %42, %46 : vector<1x8x8xf32>
    "tpu.trace_start"() <{level = 10 : i32, message = "blm,bmd->bld"}> : () -> ()
    %cst_18 = arith.constant dense<0.000000e+00> : vector<1x8x8xf32>
    %48 = tpu.matmul %47, %36, %cst_18 {dimension_numbers = #tpu.dot_dimension_numbers<[2], [1], [1], [2], [0, 0, 0, 1, 1, 2], [0], [0]>} : vector<1x8x8xf32>, vector<1x8x8xf32>, vector<1x8x8xf32> -> vector<1x8x8xf32>
    "tpu.trace_stop"() : () -> ()
    %49 = vector.shape_cast %48 : vector<1x8x8xf32> to vector<8x8xf32>
    %50 = vector.extract_strided_slice %30 {offsets = [0, 8], sizes = [8, 8], strides = [1, 1]} : vector<8x96xf32> to vector<8x8xf32>
    %51 = vector.shape_cast %50 : vector<8x8xf32> to vector<1x8x8xf32>
    %52 = vector.extract_strided_slice %30 {offsets = [0, 40], sizes = [8, 8], strides = [1, 1]} : vector<8x96xf32> to vector<8x8xf32>
    %53 = vector.shape_cast %52 : vector<8x8xf32> to vector<1x8x8xf32>
    %54 = vector.extract_strided_slice %30 {offsets = [0, 72], sizes = [8, 8], strides = [1, 1]} : vector<8x96xf32> to vector<8x8xf32>
    %55 = vector.shape_cast %54 : vector<8x8xf32> to vector<1x8x8xf32>
    "tpu.trace_start"() <{level = 10 : i32, message = "bld,bmd->blm"}> : () -> ()
    %cst_19 = arith.constant dense<0.000000e+00> : vector<1x8x8xf32>
    %56 = tpu.matmul %51, %53, %cst_19 {dimension_numbers = #tpu.dot_dimension_numbers<[2], [2], [1], [1], [0, 0, 0, 1, 1, 1], [0], [0]>} : vector<1x8x8xf32>, vector<1x8x8xf32>, vector<1x8x8xf32> -> vector<1x8x8xf32>
    "tpu.trace_stop"() : () -> ()
    %cst_20 = arith.constant dense<0xFF800000> : vector<1x8xf32>
    %57 = vector.multi_reduction <maximumf>, %56, %cst_20 [2] : vector<1x8x8xf32> to vector<1x8xf32>
    %58 = vector.shape_cast %57 : vector<1x8xf32> to vector<1x8x1xf32>
    %59 = vector.broadcast %58 : vector<1x8x1xf32> to vector<1x8x8xf32>
    %60 = arith.subf %56, %59 : vector<1x8x8xf32>
    %61 = math.exp %60 : vector<1x8x8xf32>
    %cst_21 = arith.constant dense<0.000000e+00> : vector<1x8xf32>
    %62 = vector.multi_reduction <add>, %61, %cst_21 [2] : vector<1x8x8xf32> to vector<1x8xf32>
    %63 = vector.shape_cast %62 : vector<1x8xf32> to vector<1x8x1xf32>
    %64 = tpu.reciprocal %63 {approx = true} : vector<1x8x1xf32> -> vector<1x8x1xf32>
    %65 = vector.broadcast %64 : vector<1x8x1xf32> to vector<1x8x8xf32>
    %66 = arith.mulf %61, %65 : vector<1x8x8xf32>
    "tpu.trace_start"() <{level = 10 : i32, message = "blm,bmd->bld"}> : () -> ()
    %cst_22 = arith.constant dense<0.000000e+00> : vector<1x8x8xf32>
    %67 = tpu.matmul %66, %55, %cst_22 {dimension_numbers = #tpu.dot_dimension_numbers<[2], [1], [1], [2], [0, 0, 0, 1, 1, 2], [0], [0]>} : vector<1x8x8xf32>, vector<1x8x8xf32>, vector<1x8x8xf32> -> vector<1x8x8xf32>
    "tpu.trace_stop"() : () -> ()
    %68 = vector.shape_cast %67 : vector<1x8x8xf32> to vector<8x8xf32>
    %69 = vector.extract_strided_slice %30 {offsets = [0, 16], sizes = [8, 8], strides = [1, 1]} : vector<8x96xf32> to vector<8x8xf32>
    %70 = vector.shape_cast %69 : vector<8x8xf32> to vector<1x8x8xf32>
    %71 = vector.extract_strided_slice %30 {offsets = [0, 48], sizes = [8, 8], strides = [1, 1]} : vector<8x96xf32> to vector<8x8xf32>
    %72 = vector.shape_cast %71 : vector<8x8xf32> to vector<1x8x8xf32>
    %73 = vector.extract_strided_slice %30 {offsets = [0, 80], sizes = [8, 8], strides = [1, 1]} : vector<8x96xf32> to vector<8x8xf32>
    %74 = vector.shape_cast %73 : vector<8x8xf32> to vector<1x8x8xf32>
    "tpu.trace_start"() <{level = 10 : i32, message = "bld,bmd->blm"}> : () -> ()
    %cst_23 = arith.constant dense<0.000000e+00> : vector<1x8x8xf32>
    %75 = tpu.matmul %70, %72, %cst_23 {dimension_numbers = #tpu.dot_dimension_numbers<[2], [2], [1], [1], [0, 0, 0, 1, 1, 1], [0], [0]>} : vector<1x8x8xf32>, vector<1x8x8xf32>, vector<1x8x8xf32> -> vector<1x8x8xf32>
    "tpu.trace_stop"() : () -> ()
    %cst_24 = arith.constant dense<0xFF800000> : vector<1x8xf32>
    %76 = vector.multi_reduction <maximumf>, %75, %cst_24 [2] : vector<1x8x8xf32> to vector<1x8xf32>
    %77 = vector.shape_cast %76 : vector<1x8xf32> to vector<1x8x1xf32>
    %78 = vector.broadcast %77 : vector<1x8x1xf32> to vector<1x8x8xf32>
    %79 = arith.subf %75, %78 : vector<1x8x8xf32>
    %80 = math.exp %79 : vector<1x8x8xf32>
    %cst_25 = arith.constant dense<0.000000e+00> : vector<1x8xf32>
    %81 = vector.multi_reduction <add>, %80, %cst_25 [2] : vector<1x8x8xf32> to vector<1x8xf32>
    %82 = vector.shape_cast %81 : vector<1x8xf32> to vector<1x8x1xf32>
    %83 = tpu.reciprocal %82 {approx = true} : vector<1x8x1xf32> -> vector<1x8x1xf32>
    %84 = vector.broadcast %83 : vector<1x8x1xf32> to vector<1x8x8xf32>
    %85 = arith.mulf %80, %84 : vector<1x8x8xf32>
    "tpu.trace_start"() <{level = 10 : i32, message = "blm,bmd->bld"}> : () -> ()
    %cst_26 = arith.constant dense<0.000000e+00> : vector<1x8x8xf32>
    %86 = tpu.matmul %85, %74, %cst_26 {dimension_numbers = #tpu.dot_dimension_numbers<[2], [1], [1], [2], [0, 0, 0, 1, 1, 2], [0], [0]>} : vector<1x8x8xf32>, vector<1x8x8xf32>, vector<1x8x8xf32> -> vector<1x8x8xf32>
    "tpu.trace_stop"() : () -> ()
    %87 = vector.shape_cast %86 : vector<1x8x8xf32> to vector<8x8xf32>
    %88 = vector.extract_strided_slice %30 {offsets = [0, 24], sizes = [8, 8], strides = [1, 1]} : vector<8x96xf32> to vector<8x8xf32>
    %89 = vector.shape_cast %88 : vector<8x8xf32> to vector<1x8x8xf32>
    %90 = vector.extract_strided_slice %30 {offsets = [0, 56], sizes = [8, 8], strides = [1, 1]} : vector<8x96xf32> to vector<8x8xf32>
    %91 = vector.shape_cast %90 : vector<8x8xf32> to vector<1x8x8xf32>
    %92 = vector.extract_strided_slice %30 {offsets = [0, 88], sizes = [8, 8], strides = [1, 1]} : vector<8x96xf32> to vector<8x8xf32>
    %93 = vector.shape_cast %92 : vector<8x8xf32> to vector<1x8x8xf32>
    "tpu.trace_start"() <{level = 10 : i32, message = "bld,bmd->blm"}> : () -> ()
    %cst_27 = arith.constant dense<0.000000e+00> : vector<1x8x8xf32>
    %94 = tpu.matmul %89, %91, %cst_27 {dimension_numbers = #tpu.dot_dimension_numbers<[2], [2], [1], [1], [0, 0, 0, 1, 1, 1], [0], [0]>} : vector<1x8x8xf32>, vector<1x8x8xf32>, vector<1x8x8xf32> -> vector<1x8x8xf32>
    "tpu.trace_stop"() : () -> ()
    %cst_28 = arith.constant dense<0xFF800000> : vector<1x8xf32>
    %95 = vector.multi_reduction <maximumf>, %94, %cst_28 [2] : vector<1x8x8xf32> to vector<1x8xf32>
    %96 = vector.shape_cast %95 : vector<1x8xf32> to vector<1x8x1xf32>
    %97 = vector.broadcast %96 : vector<1x8x1xf32> to vector<1x8x8xf32>
    %98 = arith.subf %94, %97 : vector<1x8x8xf32>
    %99 = math.exp %98 : vector<1x8x8xf32>
    %cst_29 = arith.constant dense<0.000000e+00> : vector<1x8xf32>
    %100 = vector.multi_reduction <add>, %99, %cst_29 [2] : vector<1x8x8xf32> to vector<1x8xf32>
    %101 = vector.shape_cast %100 : vector<1x8xf32> to vector<1x8x1xf32>
    %102 = tpu.reciprocal %101 {approx = true} : vector<1x8x1xf32> -> vector<1x8x1xf32>
    %103 = vector.broadcast %102 : vector<1x8x1xf32> to vector<1x8x8xf32>
    %104 = arith.mulf %99, %103 : vector<1x8x8xf32>
    "tpu.trace_start"() <{level = 10 : i32, message = "blm,bmd->bld"}> : () -> ()
    %cst_30 = arith.constant dense<0.000000e+00> : vector<1x8x8xf32>
    %105 = tpu.matmul %104, %93, %cst_30 {dimension_numbers = #tpu.dot_dimension_numbers<[2], [1], [1], [2], [0, 0, 0, 1, 1, 2], [0], [0]>} : vector<1x8x8xf32>, vector<1x8x8xf32>, vector<1x8x8xf32> -> vector<1x8x8xf32>
    "tpu.trace_stop"() : () -> ()
    %106 = vector.shape_cast %105 : vector<1x8x8xf32> to vector<8x8xf32>
    %107 = tpu.concatenate %49, %68, %87, %106 in 1 : vector<8x8xf32>, vector<8x8xf32>, vector<8x8xf32>, vector<8x8xf32> -> vector<8x32xf32>
    %c0_31 = arith.constant 0 : index
    %c0_32 = arith.constant 0 : index
    %108 = vector.load %arg6[%c0_31, %c0_32] : memref<32x32xf32, #tpu.memory_space<vmem>>, vector<32x32xf32>
    %cst_33 = arith.constant dense<0.000000e+00> : vector<8x32xf32>
    %109 = tpu.matmul %107, %108, %cst_33 {dimension_numbers = #tpu.dot_dimension_numbers<[1], [0], [0], [1], [0, 0, 1, 1], [], []>} : vector<8x32xf32>, vector<32x32xf32>, vector<8x32xf32> -> vector<8x32xf32>
    %c0_34 = arith.constant 0 : index
    %c0_35 = arith.constant 0 : index
    %110 = vector.load %arg7[%c0_34, %c0_35] : memref<1x32xf32, #tpu.memory_space<vmem>>, vector<1x32xf32>
    %111 = vector.broadcast %110 : vector<1x32xf32> to vector<8x32xf32>
    %112 = arith.addf %109, %111 : vector<8x32xf32>
    %113 = arith.addf %1, %112 : vector<8x32xf32>
    %c0_36 = arith.constant 0 : index
    %c0_37 = arith.constant 0 : index
    %114 = vector.load %arg8[%c0_36, %c0_37] : memref<1x32xf32, #tpu.memory_space<vmem>>, vector<1x32xf32>
    %c0_38 = arith.constant 0 : index
    %c0_39 = arith.constant 0 : index
    %115 = vector.load %arg9[%c0_38, %c0_39] : memref<1x32xf32, #tpu.memory_space<vmem>>, vector<1x32xf32>
    %cst_40 = arith.constant dense<0.000000e+00> : vector<8xf32>
    %116 = vector.multi_reduction <add>, %113, %cst_40 [1] : vector<8x32xf32> to vector<8xf32>
    %117 = vector.shape_cast %116 : vector<8xf32> to vector<8x1xf32>
    %cst_41 = arith.constant 3.200000e+01 : f32
    %118 = vector.broadcast %cst_41 : f32 to vector<8x1xf32>
    %119 = arith.divf %117, %118 : vector<8x1xf32>
    %120 = vector.broadcast %119 : vector<8x1xf32> to vector<8x32xf32>
    %121 = arith.subf %113, %120 : vector<8x32xf32>
    %122 = arith.mulf %121, %121 : vector<8x32xf32>
    %cst_42 = arith.constant dense<0.000000e+00> : vector<8xf32>
    %123 = vector.multi_reduction <add>, %122, %cst_42 [1] : vector<8x32xf32> to vector<8xf32>
    %124 = vector.shape_cast %123 : vector<8xf32> to vector<8x1xf32>
    %cst_43 = arith.constant 3.200000e+01 : f32
    %125 = vector.broadcast %cst_43 : f32 to vector<8x1xf32>
    %126 = arith.divf %124, %125 : vector<8x1xf32>
    %127 = vector.broadcast %119 : vector<8x1xf32> to vector<8x32xf32>
    %128 = arith.subf %113, %127 : vector<8x32xf32>
    %cst_44 = arith.constant 9.99999974E-6 : f32
    %129 = vector.broadcast %cst_44 : f32 to vector<8x1xf32>
    %130 = arith.addf %126, %129 : vector<8x1xf32>
    %131 = math.rsqrt %130 : vector<8x1xf32>
    %132 = vector.broadcast %131 : vector<8x1xf32> to vector<8x32xf32>
    %133 = arith.mulf %128, %132 : vector<8x32xf32>
    %134 = vector.broadcast %114 : vector<1x32xf32> to vector<8x32xf32>
    %135 = arith.mulf %133, %134 : vector<8x32xf32>
    %136 = vector.broadcast %115 : vector<1x32xf32> to vector<8x32xf32>
    %137 = arith.addf %135, %136 : vector<8x32xf32>
    %c0_45 = arith.constant 0 : index
    %c0_46 = arith.constant 0 : index
    %138 = vector.load %arg10[%c0_45, %c0_46] : memref<32x64xf32, #tpu.memory_space<vmem>>, vector<32x64xf32>
    %cst_47 = arith.constant dense<0.000000e+00> : vector<8x64xf32>
    %139 = tpu.matmul %137, %138, %cst_47 {dimension_numbers = #tpu.dot_dimension_numbers<[1], [0], [0], [1], [0, 0, 1, 1], [], []>} : vector<8x32xf32>, vector<32x64xf32>, vector<8x64xf32> -> vector<8x64xf32>
    %c0_48 = arith.constant 0 : index
    %c0_49 = arith.constant 0 : index
    %140 = vector.load %arg11[%c0_48, %c0_49] : memref<1x64xf32, #tpu.memory_space<vmem>>, vector<1x64xf32>
    %141 = vector.broadcast %140 : vector<1x64xf32> to vector<8x64xf32>
    %142 = arith.addf %139, %141 : vector<8x64xf32>
    %cst_50 = arith.constant 5.000000e-01 : f32
    %143 = vector.broadcast %cst_50 : f32 to vector<8x64xf32>
    %144 = arith.mulf %143, %142 : vector<8x64xf32>
    %145 = arith.mulf %142, %142 : vector<8x64xf32>
    %146 = arith.mulf %145, %142 : vector<8x64xf32>
    %cst_51 = arith.constant 4.471500e-02 : f32
    %147 = vector.broadcast %cst_51 : f32 to vector<8x64xf32>
    %148 = arith.mulf %147, %146 : vector<8x64xf32>
    %149 = arith.addf %142, %148 : vector<8x64xf32>
    %cst_52 = arith.constant 0.797884583 : f32
    %150 = vector.broadcast %cst_52 : f32 to vector<8x64xf32>
    %151 = arith.mulf %150, %149 : vector<8x64xf32>
    %152 = math.tanh %151 : vector<8x64xf32>
    %cst_53 = arith.constant 1.000000e+00 : f32
    %153 = vector.broadcast %cst_53 : f32 to vector<8x64xf32>
    %154 = arith.addf %153, %152 : vector<8x64xf32>
    %155 = arith.mulf %144, %154 : vector<8x64xf32>
    %c0_54 = arith.constant 0 : index
    %c0_55 = arith.constant 0 : index
    %156 = vector.load %arg12[%c0_54, %c0_55] : memref<64x32xf32, #tpu.memory_space<vmem>>, vector<64x32xf32>
    %cst_56 = arith.constant dense<0.000000e+00> : vector<8x32xf32>
    %157 = tpu.matmul %155, %156, %cst_56 {dimension_numbers = #tpu.dot_dimension_numbers<[1], [0], [0], [1], [0, 0, 1, 1], [], []>} : vector<8x64xf32>, vector<64x32xf32>, vector<8x32xf32> -> vector<8x32xf32>
    %c0_57 = arith.constant 0 : index
    %c0_58 = arith.constant 0 : index
    %158 = vector.load %arg13[%c0_57, %c0_58] : memref<1x32xf32, #tpu.memory_space<vmem>>, vector<1x32xf32>
    %159 = vector.broadcast %158 : vector<1x32xf32> to vector<8x32xf32>
    %160 = arith.addf %157, %159 : vector<8x32xf32>
    %161 = arith.addf %113, %160 : vector<8x32xf32>
    %162 = vector.shape_cast %161 : vector<8x32xf32> to vector<1x8x32xf32>
    %c0_59 = arith.constant 0 : index
    %c0_60 = arith.constant 0 : index
    %c0_61 = arith.constant 0 : index
    %163 = vector.load %arg14[%c0_59, %c0_60, %c0_61] : memref<1x8x32xf32, #tpu.memory_space<vmem>>, vector<1x8x32xf32>
    tpu.vector_store %arg14[%c0_59, %c0_60, %c0_61], %162 {strides = array<i32>} : memref<1x8x32xf32, #tpu.memory_space<vmem>>, vector<1x8x32xf32>,
    return
  }
  func.func @transform_0(%arg0: i32) -> (i32, i32, i32) {
    %c0_i32 = arith.constant 0 : i32
    %c0_i32_0 = arith.constant 0 : i32
    %c0_i32_1 = arith.constant 0 : i32
    return %arg0, %c0_i32, %c0_i32_0 : i32, i32, i32
  }
  func.func @transform_1(%arg0: i32) -> (i32, i32) {
    %c0_i32 = arith.constant 0 : i32
    %c0_i32_0 = arith.constant 0 : i32
    %c0_i32_1 = arith.constant 0 : i32
    return %c0_i32, %c0_i32_0 : i32, i32
  }
  func.func @transform_2(%arg0: i32) -> (i32, i32) {
    %c0_i32 = arith.constant 0 : i32
    %c0_i32_0 = arith.constant 0 : i32
    %c0_i32_1 = arith.constant 0 : i32
    return %c0_i32, %c0_i32_0 : i32, i32
  }
  func.func @transform_3(%arg0: i32) -> (i32, i32) {
    %c0_i32 = arith.constant 0 : i32
    %c0_i32_0 = arith.constant 0 : i32
    %c0_i32_1 = arith.constant 0 : i32
    return %c0_i32, %c0_i32_0 : i32, i32
  }
  func.func @transform_4(%arg0: i32) -> (i32, i32) {
    %c0_i32 = arith.constant 0 : i32
    %c0_i32_0 = arith.constant 0 : i32
    %c0_i32_1 = arith.constant 0 : i32
    return %c0_i32, %c0_i32_0 : i32, i32
  }
  func.func @transform_5(%arg0: i32) -> (i32, i32) {
    %c0_i32 = arith.constant 0 : i32
    %c0_i32_0 = arith.constant 0 : i32
    %c0_i32_1 = arith.constant 0 : i32
    return %c0_i32, %c0_i32_0 : i32, i32
  }
  func.func @transform_6(%arg0: i32) -> (i32, i32) {
    %c0_i32 = arith.constant 0 : i32
    %c0_i32_0 = arith.constant 0 : i32
    %c0_i32_1 = arith.constant 0 : i32
    return %c0_i32, %c0_i32_0 : i32, i32
  }
  func.func @transform_7(%arg0: i32) -> (i32, i32) {
    %c0_i32 = arith.constant 0 : i32
    %c0_i32_0 = arith.constant 0 : i32
    %c0_i32_1 = arith.constant 0 : i32
    return %c0_i32, %c0_i32_0 : i32, i32
  }
  func.func @transform_8(%arg0: i32) -> (i32, i32) {
    %c0_i32 = arith.constant 0 : i32
    %c0_i32_0 = arith.constant 0 : i32
    %c0_i32_1 = arith.constant 0 : i32
    return %c0_i32, %c0_i32_0 : i32, i32
  }
  func.func @transform_9(%arg0: i32) -> (i32, i32) {
    %c0_i32 = arith.constant 0 : i32
    %c0_i32_0 = arith.constant 0 : i32
    %c0_i32_1 = arith.constant 0 : i32
    return %c0_i32, %c0_i32_0 : i32, i32
  }
  func.func @transform_10(%arg0: i32) -> (i32, i32) {
    %c0_i32 = arith.constant 0 : i32
    %c0_i32_0 = arith.constant 0 : i32
    %c0_i32_1 = arith.constant 0 : i32
    return %c0_i32, %c0_i32_0 : i32, i32
  }
  func.func @transform_11(%arg0: i32) -> (i32, i32) {
    %c0_i32 = arith.constant 0 : i32
    %c0_i32_0 = arith.constant 0 : i32
    %c0_i32_1 = arith.constant 0 : i32
    return %c0_i32, %c0_i32_0 : i32, i32
  }
  func.func @transform_12(%arg0: i32) -> (i32, i32) {
    %c0_i32 = arith.constant 0 : i32
    %c0_i32_0 = arith.constant 0 : i32
    %c0_i32_1 = arith.constant 0 : i32
    return %c0_i32, %c0_i32_0 : i32, i32
  }
  func.func @transform_13(%arg0: i32) -> (i32, i32, i32) {
    %c0_i32 = arith.constant 0 : i32
    %c0_i32_0 = arith.constant 0 : i32
    %c0_i32_1 = arith.constant 0 : i32
    return %arg0, %c0_i32, %c0_i32_0 : i32, i32, i32
  }
}

</mosaic_0001>

<bundles_post_ra>
// kernel: attention_block_pallas.1
= control target key start
LH: loop header
LB: loop body
LE: loop exit
PB: predicated region body
PF: predicated region fallthrough
CT: control target
= control target key end

     0   :  { %s1917_s25 = smov 0   ;;  %s2120_s0 = inlined_call_operand.vmem [shape: f32[2,8,32], index: 0, kind: input, shape index: {}]   ;;  %s2121_s1 = inlined_call_operand.vmem [shape: f32[1,32], index: 1, kind: input, shape index: {}]   ;;  %s2122_s2 = inlined_call_operand.vmem [shape: f32[1,32], index: 2, kind: input, shape index: {}]   ;;  %s2123_s3 = inlined_call_operand.vmem [shape: f32[32,96], index: 3, kind: input, shape index: {}]   ;;  %s2124_s4 = inlined_call_operand.vmem [shape: f32[1,96], index: 4, kind: input, shape index: {}]   ;;  %s2125_s5 = inlined_call_operand.vmem [shape: f32[32,32], index: 5, kind: input, shape index: {}]   ;;  %s2126_s6 = inlined_call_operand.vmem [shape: f32[1,32], index: 6, kind: input, shape index: {}]   ;;  %s2127_s7 = inlined_call_operand.vmem [shape: f32[1,32], index: 7, kind: input, shape index: {}]   ;;  %s2128_s8 = inlined_call_operand.vmem [shape: f32[1,32], index: 8, kind: input, shape index: {}]   ;;  %s2129_s9 = inlined_call_operand.vmem [shape: f32[32,64], index: 9, kind: input, shape index: {}]   ;;  %s2130_s10 = inlined_call_operand.vmem [shape: f32[1,64], index: 10, kind: input, shape index: {}]   ;;  %s2131_s11 = inlined_call_operand.vmem [shape: f32[64,32], index: 11, kind: input, shape index: {}]   ;;  %s2132_s12 = inlined_call_operand.vmem [shape: f32[1,32], index: 12, kind: input, shape index: {}]   ;;  %s2133_s13 = inlined_call_operand.vmem [shape: f32[2,8,32], index: 13, kind: output, shape index: {}]  }
   0x1 LB: > { %s1580_s26 = sadd.s32 4294967295, %s1828_s25   ;;  %p1584_p0 = scmp.ge.s32.totalorder %s1828_s25, 1  ;;  %s1828_s25 = sphi %s1917_s25, %s23_s25  }
   0x2   : > { %p386_p1 = scmp.lt.s32.totalorder %s1828_s25, 3 }
   0x4   : > { %p387_p2 = pnand %p1584_p0, %p386_p1 }
   0x5   : > { %p428_p3 = scmp.lt.s32.totalorder (!%p387_p2), %s1580_s26, 1  ;;  %vm439_vm0 = vcmask (!%p387_p2), 261120   ;;  %v468_v7 = vld [vmem:[%s2123_s3] sm:$0xff] (!%p387_p2)  ;;  %v469_v8 = vld [vmem:[%s2123_s3 + $0x8] sm:$0xff] (!%p387_p2)  ;;  %v470_v9 = vld [vmem:[%s2123_s3 + $0x10] sm:$0xff] (!%p387_p2)  ;;  %v1830_v10 = vmov (!%p387_p2), 0.0|0.0  }
   0x6   : > { %390 = sbr.rel (%p387_p2) target bundleno = 2518 (0x9d6), region = 72  ;;  %1745 = vmatprep.subr.bf16.mxu1 (!%p387_p2), %v1830_v10  ;;  %v1746_v11 = vpack.c.bf16 (!%p387_p2), %v469_v8, %v468_v7  ;;  %v471_v12 = vld [vmem:[%s2123_s3 + $0x18] sm:$0xff] (!%p387_p2)  ;;  %vm1831_vm1 = vmmov (!%p387_p2), 0   ;;  %v1832_v13 = vmov (!%p387_p2), 0.0   ;;  %v1587_v19 = vld [vmem:[%s2121_s1] ss:$0 sm:$0xff] (!%p387_p2) }
   0x7   : > { %1661 = vmatprep.mubr.msk.f32.mxu1 (!%p387_p2), %vm1831_vm1, %v1832_v13  ;;  %1674 = vmatprep.subr.mxu0 (!%p387_p2), %v1832_v13  ;;  %v1749_v14 = vpack.c.bf16 (!%p387_p2), %v471_v12, %v470_v9  ;;  %v1588_v21 = vld [vmem:[%s2122_s2] ss:$0 sm:$0xff] (!%p387_p2)  ;;  %s1833_s14 = smov (!%p387_p2), 120   ;;  %s1834_s15 = smov (!%p387_p2), 96   ;;  %vm555_vm2 = vcmask (!%p387_p2), 64512   ;;  %vm1225_vm3 = vcmask (!%p387_p2), 130048  }
   0x8   : > { %1676 = vmatprep.mubr.msk.f32.mxu0 (!%p387_p2), %vm1831_vm1, %v1832_v13  ;;  %1747 = vmatpush3.bf16.msra.mxu1 (!%p387_p2), %v1746_v11  ;;  %v1589_v24 = vld [vmem:[%s2124_s4] ss:$0 sm:$0xff] (!%p387_p2)  ;;  %s1835_s16 = smov (!%p387_p2), 88   ;;  %s1836_s17 = smov (!%p387_p2), 80   ;;  %vm1227_vm4 = vcmask (!%p387_p2), 195584   ;;  %vm1451_vm5 = vcmask (!%p387_p2), 523264  }
   0x9   : > { %1748 = vmatprep.subr.bf16.mxu1 (!%p387_p2), %v1830_v10  ;;  %s1837_s18 = smov (!%p387_p2), 112   ;;  %s1838_s19 = smov (!%p387_p2), 72  }
   0xa   : > { %s1839_s20 = smov (!%p387_p2), 104   ;;  %s1840_s21 = smov (!%p387_p2), 64  }
   0xb   : > { %s1841_s22 = smov (!%p387_p2), 48   ;;  %s1842_s23 = smov (!%p387_p2), 40  }
   0xc   : > { %1750 = vmatpush3.bf16.msra.mxu1 (!%p387_p2), %v1749_v14  ;;  %s1843_s24 = smov (!%p387_p2), 56  }
   0xd   : > { %s2135_s26 = smov (!%p428_p3, %s1580_s26), 1  ;;  %1664 = vmatprep.subr.mxu1 %v1832_v13 }
   0xe   : > { %s1585_s27 = sshll.u32 %s2135_s26, 3 }
   0xf   : > { %s431_s30 = scalar_lea.vmem %s2120_s0, %s1585_s27 }
  0x10   : > { %v1933_v0 = vld [vmem:[%s431_s30] sm:$0xff] }
  0x11   : > { %v440_v1 = vsel %vm439_vm0, %v1933_v0, 0.0 }
  0x12   : > { %441 = vadd.xlane.f32.xlu0 %v440_v1 }
  0x9f   : > { %v442_v2 = vpop.xlane.xlu0 %441 }
  0xa0   : > { %v444_v3 = vmul.f32 0.03125, %v442_v2 }
  0xa2   : > { %v445_v4 = vsub.f32 %v1933_v0, %v444_v3 }
  0xa4   : > { %v446_v5 = vmul.f32 %v445_v4, %v445_v4 }
  0xa6   : > { %v447_v6 = vsel %vm439_vm0, %v446_v5, 0.0 }
  0xa7   : > { %448 = vadd.xlane.f32.xlu0 %v447_v6 }
 0x134   : > { %v449_v15 = vpop.xlane.xlu0 %448 }
 0x135   : > { %v450_v16 = vmul.f32 0.03125, %v449_v15 }
 0x137   : > { %v451_v17 = vadd.f32 1e-05, %v450_v16 }
 0x139   : > { %1800 = vrsqrt.f32 %v451_v17 }
 0x143   : > { %v1801_v18 = vpop.eup %1800 }
 0x144   : > { %v453_v20 = vmul.f32 %v1801_v18, %v445_v4 }
 0x146   : > { %v460_v22 = vmul.f32 %v1587_v19, %v453_v20 }
 0x148   : > { %v467_v23 = vadd.f32 %v1588_v21, %v460_v22  ;;  %v1229_v22 = vld [vmem:[%s2125_s5] sm:$0xff] }
 0x14a   : > { %1662 = vmatmul.mubr.msk.f32.vlgmr.msra.gmra.mrb[0].mxu1 %vm439_vm0, %v467_v23  ;;  %v1230_v23 = vld [vmem:[%s2125_s5 + $0x8] sm:$0xff] }
 0x14b   : > { %1666 = vmatprep.mubr.msk.f32.mxu1 %vm1831_vm1, %v1832_v13 }
 0x21d   : > { %v548_v25 = vpop.f32.mrb[0].mxu1 }
 0x21e   : > { %v1971_v26 = vadd.f32 %v1589_v24, %v548_v25  ;;  %v1663_v27 = vpop.f32.mrb[1].mxu1  ;;  %v1752_v24 = vpack.c.bf16 %v1230_v23, %v1229_v22 }
 0x21f   : > { %v1231_v27 = vld [vmem:[%s2125_s5 + $0x10] sm:$0xff] }
 0x220   : > { %717 = vrot.lane.b32.xlu0 %v1971_v26, %s1833_s14  ;;  %553 = vrot.lane.b32.xlu1 %v1971_v26, %s1834_s15 }
 0x224   : > { %719 = vrot.lane.b32.xlu1 %v1971_v26, %s1835_s16  ;;  %s435_s16 = scalar_lea.vmem %s2133_s13, %s1585_s27 }
 0x228   : > { %884 = vrot.lane.b32.xlu1 %v1971_v26, %s1836_s17 }
 0x22c   : > { %882 = vrot.lane.b32.xlu1 %v1971_v26, %s1837_s18 }
 0x230   : > { %1049 = vrot.lane.b32.xlu1 %v1971_v26, %s1838_s19  ;;  %s1844_s19 = smov 8  }
 0x234   : > { %1047 = vrot.lane.b32.xlu1 %v1971_v26, %s1839_s20  ;;  %s1845_s20 = smov 16  }
 0x292   : > { %v554_v28 = vpop.permute.xlu1 %553  ;;  %v718_v30 = vpop.permute.xlu0 %717 }
 0x293   : > { %1665 = vmatpush3.xpose.msk.msra.mxu1 %vm555_vm2, %v554_v28  ;;  %v1232_v28 = vld [vmem:[%s2125_s5 + $0x18] sm:$0xff] }
 0x294   : > { %1669 = vmatprep.subr.mxu1 %v1832_v13 }
 0x296   : > { %1667 = vmatmul.mubr.msk.f32.vlgmr.msra.gmra.mrb[2].mxu1 %vm555_vm2, %v1971_v26  ;;  %v720_v29 = vpop.permute.xlu1 %719 }
 0x297   : > { %1675 = vmatpush3.xpose.msk.msra.mxu0 %vm555_vm2, %v720_v29  ;;  %1671 = vmatprep.mubr.msk.f32.mxu1 %vm1831_vm1, %v1832_v13  ;;  %v1755_v29 = vpack.c.bf16 %v1232_v28, %v1231_v27 }
 0x298   : > { %1684 = vmatprep.subr.mxu0 %v1832_v13 }
 0x29a   : > { %1677 = vmatmul.mubr.msk.f32.vlgmr.msra.gmra.mrb[0].mxu0 %vm555_vm2, %v718_v30  ;;  %v885_v31 = vpop.permute.xlu1 %884 }
 0x29b   : > { %1685 = vmatpush3.xpose.msk.msra.mxu0 %vm555_vm2, %v885_v31  ;;  %1686 = vmatprep.mubr.msk.f32.mxu0 %vm1831_vm1, %v1832_v13 }
 0x29c   : > { %1694 = vmatprep.subr.mxu0 %v1832_v13 }
 0x29e   : > { %v883_v32 = vpop.permute.xlu1 %882 }
 0x29f   : > { %1687 = vmatmul.mubr.msk.f32.vlgmr.msra.gmra.mrb[2].mxu0 %vm555_vm2, %v883_v32 }
 0x2a0   : > { %1696 = vmatprep.mubr.msk.f32.mxu0 %vm1831_vm1, %v1832_v13 }
 0x2a2   : > { %v1050_v33 = vpop.permute.xlu1 %1049 }
 0x2a3   : > { %1695 = vmatpush3.xpose.msk.msra.mxu0 %vm555_vm2, %v1050_v33 }
 0x2a4   : > { %1751 = vmatprep.subr.bf16.mxu0 %v1830_v10 }
 0x2a6   : > { %v1048_v34 = vpop.permute.xlu1 %1047 }
 0x2a7   : > { %1697 = vmatmul.mubr.msk.f32.vlgmr.msra.gmra.mrb[4].mxu0 %vm555_vm2, %v1048_v34 }
 0x2a8   : > { %1712 = vmatprep.mubr.msk.f32.mxu0 %vm1831_vm1, %v1832_v13  ;;  %1753 = vmatpush3.bf16.msra.mxu0 %v1752_v24 }
 0x2a9   : > { %1754 = vmatprep.subr.bf16.mxu0 %v1830_v10 }
 0x2ac   : > { %1756 = vmatpush3.bf16.msra.mxu0 %v1755_v29  ;;  %v1609_v29 = vld [vmem:[%s2132_s12] ss:$0 sm:$0xff] }
 0x2ad   : > { %1763 = vmatprep.subr.bf16.mxu0 %v1830_v10 }
 0x369   : > { %v626_v35 = vpop.f32.mrb[2].mxu1 }
 0x36a   : > { %v1668_v36 = vpop.f32.mrb[3].mxu1  ;;  %v630_v37 = vsel %vm555_vm2, %v626_v35, -inf }
 0x36b   : > { %631 = vmax.xlane.f32.xlu1 %v630_v37 }
 0x36d   : > { %v791_v38 = vpop.f32.mrb[0].mxu0 }
 0x36e   : > { %v1678_v39 = vpop.f32.mrb[1].mxu0  ;;  %v795_v40 = vsel %vm555_vm2, %v791_v38, -inf }
 0x36f   : > { %796 = vmax.xlane.f32.xlu0 %v795_v40 }
 0x372   : > { %v956_v41 = vpop.f32.mrb[2].mxu0 }
 0x373   : > { %v1688_v42 = vpop.f32.mrb[3].mxu0  ;;  %v960_v43 = vsel %vm555_vm2, %v956_v41, -inf }
 0x374   : > { %961 = vmax.xlane.f32.xlu1 %v960_v43  ;;  %v1603_v42 = vld [vmem:[%s2126_s6] ss:$0 sm:$0xff] }
 0x37a   : > { %v1121_v44 = vpop.f32.mrb[4].mxu0 }
 0x37b   : > { %v1698_v45 = vpop.f32.mrb[5].mxu0  ;;  %v1125_v46 = vsel %vm555_vm2, %v1121_v44, -inf }
 0x37c   : > { %1126 = vmax.xlane.f32.xlu0 %v1125_v46 }
 0x385   : > { %641 = vrot.lane.b32.xlu1 %v1971_v26, %s1840_s21  ;;  %s1846_s21 = smov 24  }
 0x3f8   : > { %v632_v47 = vpop.xlane.xlu1 %631 }
 0x3f9   : > { %v633_v48 = vsub.f32 %v626_v35, %v632_v47 }
 0x3fb   : > { %v634_v49 = vmul.f32 1.442695, %v633_v48 }
 0x3fc   : > { %v797_v50 = vpop.xlane.xlu0 %796 }
 0x3fd   : > { %1802 = vpow2.f32 %v634_v49  ;;  %v798_v51 = vsub.f32 %v791_v38, %v797_v50 }
 0x3ff   : > { %v799_v52 = vmul.f32 1.442695, %v798_v51 }
 0x401   : > { %1804 = vpow2.f32 %v799_v52  ;;  %v962_v53 = vpop.xlane.xlu1 %961  ;;  %v1343_v52 = vld [vmem:[%s2129_s9] sm:$0xff] }
 0x402   : > { %v963_v54 = vsub.f32 %v956_v41, %v962_v53 }
 0x404   : > { %v964_v55 = vmul.f32 1.442695, %v963_v54  ;;  %v1345_v54 = vld [vmem:[%s2129_s9 + $0x10] sm:$0xff] }
 0x405   : > { %v642_v56 = vpop.permute.xlu1 %641 }
 0x406   : > { %1806 = vpow2.f32 %v964_v55  ;;  %1670 = vmatpush3.msra.mxu1 %v642_v56  ;;  %v1346_v55 = vld [vmem:[%s2129_s9 + $0x18] sm:$0xff] }
 0x407   : > { %v1803_v57 = vpop.eup %1802  ;;  %1679 = vmatprep.subr.mxu1 %v1832_v13  ;;  %v1761_v56 = vpack.c.bf16 %v1346_v55, %v1345_v54 }
 0x408   : > { %v636_v58 = vsel %vm555_vm2, %v1803_v57, 0.0 }
 0x409   : > { %v1127_v59 = vpop.xlane.xlu0 %1126  ;;  %637 = vadd.xlane.f32.xlu1 %v636_v58 }
 0x40a   : > { %v1128_v60 = vsub.f32 %v1121_v44, %v1127_v59 }
 0x40b   : > { %v1805_v61 = vpop.eup %1804 }
 0x40c   : > { %v1129_v62 = vmul.f32 1.442695, %v1128_v60  ;;  %v801_v63 = vsel %vm555_vm2, %v1805_v61, 0.0 }
 0x40d   : > { %802 = vadd.xlane.f32.xlu0 %v801_v63  ;;  %v1606_v63 = vld [vmem:[%s2128_s8] ss:$0 sm:$0xff] }
 0x40e   : > { %1808 = vpow2.f32 %v1129_v62 }
 0x410   : > { %v1807_v1 = vpop.eup %1806 }
 0x411   : > { %v966_v2 = vsel %vm555_vm2, %v1807_v1, 0.0 }
 0x412   : > { %967 = vadd.xlane.f32.xlu1 %v966_v2 }
 0x418   : > { %v1809_v3 = vpop.eup %1808 }
 0x419   : > { %v1131_v4 = vsel %vm555_vm2, %v1809_v3, 0.0 }
 0x41a   : > { %1132 = vadd.xlane.f32.xlu0 %v1131_v4  ;;  %v1437_v4 = vld [vmem:[%s2131_s11 + $0x8] sm:$0xff] }
 0x423   : > { %971 = vrot.lane.b32.xlu1 %v1971_v26, %s1841_s22 }
 0x427   : > { %1136 = vrot.lane.b32.xlu1 %v1971_v26, %s1842_s23 }
 0x430   : > { %806 = vrot.lane.b32.xlu0 %v1971_v26, %s1843_s24 }
 0x496   : > { %v638_v5 = vpop.xlane.xlu1 %637 }
 0x497   : > { %1810 = vrcp.f32 %v638_v5 }
 0x49a   : > { %v803_v6 = vpop.xlane.xlu0 %802 }
 0x49b   : > { %1812 = vrcp.f32 %v803_v6  ;;  %v1438_v6 = vld [vmem:[%s2131_s11 + $0x10] sm:$0xff] }
 0x49f   : > { %v968_v7 = vpop.xlane.xlu1 %967 }
 0x4a0   : > { %1814 = vrcp.f32 %v968_v7  ;;  %v1439_v7 = vld [vmem:[%s2131_s11 + $0x18] sm:$0xff] }
 0x4a1   : > { %v1811_v8 = vpop.eup %1810 }
 0x4a2   : > { %v640_v9 = vmul.f32 %v1811_v8, %v1803_v57  ;;  %v1767_v8 = vpack.c.bf16 %v1439_v7, %v1438_v6 }
 0x4a3   : > { %v972_v15 = vpop.permute.xlu1 %971 }
 0x4a4   : > { %1672 = vmatmul.mubr.msk.f32.vlgmr.msra.gmra.mrb[4].mxu1 %vm555_vm2, %v640_v9  ;;  %v1440_v9 = vld [vmem:[%s2131_s11 + $0x20] sm:$0xff] }
 0x4a5   : > { %1681 = vmatprep.mubr.msk.f32.mxu1 %vm1831_vm1, %v1832_v13  ;;  %v1813_v12 = vpop.eup %1812 }
 0x4a6   : > { %v805_v14 = vmul.f32 %v1813_v12, %v1805_v61  ;;  %v1605_v61 = vld [vmem:[%s2127_s7] ss:$0 sm:$0xff] }
 0x4a7   : > { %v1133_v11 = vpop.xlane.xlu0 %1132  ;;  %v1137_v19 = vpop.permute.xlu1 %1136 }
 0x4a8   : > { %1816 = vrcp.f32 %v1133_v11  ;;  %v1441_v11 = vld [vmem:[%s2131_s11 + $0x28] sm:$0xff] }
 0x4a9   : > { %v1770_v12 = vpack.c.bf16 %v1441_v11, %v1440_v9 }
 0x4aa   : > { %v1815_v17 = vpop.eup %1814 }
 0x4ab   : > { %v807_v16 = vpop.permute.xlu0 %806  ;;  %v970_v18 = vmul.f32 %v1815_v17, %v1807_v1  ;;  %v1607_v17 = vld [vmem:[%s2130_s10] ss:$0 sm:$0xff] }
 0x4ac   : > { %1680 = vmatpush3.msra.mxu1 %v807_v16 }
 0x4ad   : > { %1682 = vmatmul.mubr.msk.f32.vlgmr.msra.gmra.mrb[6].mxu1 %vm555_vm2, %v805_v14  ;;  %1689 = vmatprep.subr.mxu1 %v1832_v13  ;;  %v1442_v14 = vld [vmem:[%s2131_s11 + $0x30] sm:$0xff] }
 0x4ae   : > { %1690 = vmatpush3.msra.mxu1 %v972_v15  ;;  %1691 = vmatprep.mubr.msk.f32.mxu1 %vm1831_vm1, %v1832_v13  ;;  %v1443_v15 = vld [vmem:[%s2131_s11 + $0x38] sm:$0xff] }
 0x4af   : > { %1699 = vmatprep.subr.mxu1 %v1832_v13  ;;  %v1773_v16 = vpack.c.bf16 %v1443_v15, %v1442_v14 }
 0x4b1   : > { %1692 = vmatmul.mubr.msk.f32.vlgmr.msra.gmra.mrb[8].mxu1 %vm555_vm2, %v970_v18 }
 0x4b2   : > { %v1817_v20 = vpop.eup %1816  ;;  %1700 = vmatpush3.msra.mxu1 %v1137_v19  ;;  %1701 = vmatprep.mubr.msk.f32.mxu1 %vm1831_vm1, %v1832_v13 }
 0x4b3   : > { %v1135_v21 = vmul.f32 %v1817_v20, %v1809_v3  ;;  %1757 = vmatprep.subr.bf16.mxu1 %v1830_v10  ;;  %v1436_v3 = vld [vmem:[%s2131_s11] sm:$0xff] }
 0x4b4   : > { %v1764_v5 = vpack.c.bf16 %v1437_v4, %v1436_v3 }
 0x4b5   : > { %1702 = vmatmul.mubr.msk.f32.vlgmr.msra.gmra.mrb[10].mxu1 %vm555_vm2, %v1135_v21 }
 0x4b6   : > { %1723 = vmatprep.mubr.msk.f32.mxu1 %vm1831_vm1, %v1832_v13 }
 0x577   : > { %v713_v25 = vpop.f32.mrb[4].mxu1 }
 0x578   : > { %v1673_v26 = vpop.f32.mrb[5].mxu1 }
 0x580   : > { %v878_v30 = vpop.f32.mrb[6].mxu1 }
 0x581   : > { %1213 = vrot.lane.b32.xlu0 %v878_v30, %s1844_s19  ;;  %v1683_v31 = vpop.f32.mrb[7].mxu1 }
 0x584   : > { %v1043_v32 = vpop.f32.mrb[8].mxu1 }
 0x585   : > { %1217 = vrot.lane.b32.xlu1 %v1043_v32, %s1845_s20  ;;  %v1693_v33 = vpop.f32.mrb[9].mxu1 }
 0x588   : > { %v1208_v34 = vpop.f32.mrb[10].mxu1 }
 0x589   : > { %1221 = vrot.lane.b32.xlu0 %v1208_v34, %s1846_s21  ;;  %v1703_v35 = vpop.f32.mrb[11].mxu1 }
 0x5f3   : > { %v1214_v36 = vpop.permute.xlu0 %1213 }
 0x5f4   : > { %v1224_v38 = vsel %vm555_vm2, %v713_v25, %v1214_v36 }
 0x5f7   : > { %v1218_v37 = vpop.permute.xlu1 %1217 }
 0x5f8   : > { %v1226_v39 = vsel %vm1225_vm3, %v1224_v38, %v1218_v37 }
 0x5fb   : > { %v1222_v40 = vpop.permute.xlu0 %1221 }
 0x5fc   : > { %v1228_v41 = vsel %vm1227_vm4, %v1226_v39, %v1222_v40 }
 0x5fd   : > { %1713 = vmatmul.mubr.msk.f32.vlgmr.msra.gmra.mrb[6].mxu0 %vm439_vm0, %v1228_v41 }
 0x5fe   : > { %1742 = vmatprep.mubr.msk.f32.mxu0 %vm1831_vm1, %v1832_v13  ;;  %1765 = vmatpush3.bf16.msra.mxu0 %v1764_v5 }
 0x5ff   : > { %1766 = vmatprep.subr.bf16.mxu0 %v1830_v10 }
 0x602   : > { %1768 = vmatpush3.bf16.msra.mxu0 %v1767_v8 }
 0x603   : > { %1769 = vmatprep.subr.bf16.mxu0 %v1830_v10 }
 0x606   : > { %1771 = vmatpush3.bf16.msra.mxu0 %v1770_v12 }
 0x607   : > { %1772 = vmatprep.subr.bf16.mxu0 %v1830_v10 }
 0x60a   : > { %1774 = vmatpush3.bf16.msra.mxu0 %v1773_v16 }
 0x6d0   : > { %v1309_v43 = vpop.f32.mrb[6].mxu0 }
 0x6d1   : > { %v1310_v44 = vadd.f32 %v1603_v42, %v1309_v43  ;;  %v1714_v45 = vpop.f32.mrb[7].mxu0 }
 0x6d3   : > { %v2051_v46 = vadd.f32 %v1310_v44, %v1933_v0  ;;  %v1344_v0 = vld [vmem:[%s2129_s9 + $0x8] sm:$0xff] }
 0x6d4   : > { %v1758_v53 = vpack.c.bf16 %v1344_v0, %v1343_v52 }
 0x6d5   : > { %v1316_v47 = vsel %vm439_vm0, %v2051_v46, 0.0 }
 0x6d6   : > { %1317 = vadd.xlane.f32.xlu1 %v1316_v47  ;;  %1759 = vmatpush3.bf16.msra.mxu1 %v1758_v53 }
 0x6d7   : > { %1760 = vmatprep.subr.bf16.mxu1 %v1830_v10 }
 0x6da   : > { %1762 = vmatpush3.bf16.msra.mxu1 %v1761_v56 }
 0x763   : > { %v1318_v48 = vpop.xlane.xlu1 %1317 }
 0x764   : > { %v1319_v49 = vmul.f32 0.03125, %v1318_v48 }
 0x766   : > { %v1320_v50 = vsub.f32 %v2051_v46, %v1319_v49 }
 0x768   : > { %v1321_v51 = vmul.f32 %v1320_v50, %v1320_v50 }
 0x76a   : > { %v1322_v13 = vsel %vm439_vm0, %v1321_v51, 0.0 }
 0x76b   : > { %1323 = vadd.xlane.f32.xlu0 %v1322_v13 }
 0x7f8   : > { %v1324_v57 = vpop.xlane.xlu0 %1323 }
 0x7f9   : > { %v1325_v58 = vmul.f32 0.03125, %v1324_v57 }
 0x7fb   : > { %v1326_v59 = vadd.f32 1e-05, %v1325_v58 }
 0x7fd   : > { %1818 = vrsqrt.f32 %v1326_v59 }
 0x807   : > { %v1819_v60 = vpop.eup %1818 }
 0x808   : > { %v1328_v62 = vmul.f32 %v1819_v60, %v1320_v50 }
 0x80a   : > { %v1335_v1 = vmul.f32 %v1605_v61, %v1328_v62 }
 0x80c   : > { %v1342_v2 = vadd.f32 %v1606_v63, %v1335_v1 }
 0x80e   : > { %1724 = vmatmul.mubr.msk.f32.vlgmr.msra.gmra.mrb[12].mxu1 %vm439_vm0, %v1342_v2 }
 0x8e1   : > { %v1423_v18 = vpop.f32.mrb[12].mxu1 }
 0x8e2   : > { %v1424_v19 = vadd.f32 %v1607_v17, %v1423_v18  ;;  %v1725_v20 = vpop.f32.mrb[13].mxu1 }
 0x8e4   : > { %v1428_v21 = vmul.f32 %v1424_v19, %v1424_v19  ;;  %v1427_v26 = vmul.f32 0.5, %v1424_v19 }
 0x8e6   : > { %v1429_v10 = vmul.f32 %v1428_v21, %v1424_v19 }
 0x8e8   : > { %v1430_v22 = vmul.f32 0.044715, %v1429_v10 }
 0x8ea   : > { %v1431_v23 = vadd.f32 %v1430_v22, %v1424_v19 }
 0x8ec   : > { %v1432_v24 = vmul.f32 0.7978846, %v1431_v23 }
 0x8ee   : > { %1820 = vtanh.f32 %v1432_v24 }
 0x8f8   : > { %v1821_v25 = vpop.eup %1820 }
 0x8f9   : > { %v1434_v27 = vadd.f32 1.0, %v1821_v25 }
 0x8fb   : > { %v1435_v28 = vmul.f32 %v1434_v27, %v1427_v26 }
 0x8fd   : > { %1743 = vmatmul.mubr.msk.f32.vlgmr.msra.gmra.mrb[8].mxu0 %vm1451_vm5, %v1435_v28 }
 0x9d0   : > { %v1521_v30 = vpop.f32.mrb[8].mxu0 }
 0x9d1   : > { %v1522_v31 = vadd.f32 %v1609_v29, %v1521_v30  ;;  %v1744_v32 = vpop.f32.mrb[9].mxu0 }
 0x9d3   : > { %v1525_v33 = vadd.f32 %v1522_v31, %v2051_v46 }
 0x9d5   : > { %1526 = vst.msk [vmem:[%s435_s16] sm:$0xff] %vm439_vm0, %v1525_v33 }
 0x9d6 PF: > { %s23_s25 = sadd.s32 1, %s1828_s25  }
 0x9d7   : > { %p20_p4 = scmp.ge.s32.totalorder %s23_s25, 4  }
 0x9d9   :  { %22 = sbr.rel (!%p20_p4) target bundleno = 1 (0x1), region = 102 }

</bundles_post_ra>
